<compile_context>
chip_gen: v7x
topology: tpu7x:2x2x1
jax: 0.10.0
libtpu: 0.0.40
codegen_flags: <defaults>
</compile_context>

<pallas_src>
import functools

import jax
import jax.numpy as jnp
from jax.experimental import pallas as pl
from jax.experimental.pallas import tpu as pltpu

LANE = 128


def _round_up(x: int, m: int) -> int:
    return (x + m - 1) // m * m


# -----------------------------------------------------------------------------
# Kernel: 5 matmuls (layer1 split over the two raw inputs) + biases + ReLUs,
# one (TB, *) batch tile per grid step; weights/biases stay resident in VMEM.
# -----------------------------------------------------------------------------
def _encoder_kernel(xm_ref, xc_ref, w1m_ref, w1c_ref, w2_ref, w3_ref, w4_ref,
                    b_ref, o_ref, *, compute_dtype):
    f32 = jnp.float32
    cd = compute_dtype
    b_all = b_ref[...]                                 # [4, H_pad] f32

    # Layer 1 (both branches fused via block-column weights).  No concat:
    # [xm | xc] @ W1 == xm @ W1[:MF] + xc @ W1[MF:], two dots, one f32 acc.
    acc = jnp.dot(xm_ref[...].astype(cd), w1m_ref[...],
                  preferred_element_type=f32)
    acc = acc + jnp.dot(xc_ref[...].astype(cd), w1c_ref[...],
                        preferred_element_type=f32)
    h = jnp.maximum(acc + b_all[0:1, :], 0.0)

    def dense(h, w_ref, row, relu):
        a = jnp.dot(h.astype(cd), w_ref[...], preferred_element_type=f32)
        a = a + b_all[row:row + 1, :]                  # [1, H_pad] broadcast
        return jnp.maximum(a, 0.0) if relu else a

    h = dense(h, w2_ref, 1, True)       # branch layer 2 (block-diagonal)
    h = dense(h, w3_ref, 2, True)       # combined layer 1
    out = dense(h, w4_ref, 3, False)    # combined layer 2 (no ReLU)
    o_ref[...] = out.astype(o_ref.dtype)


# -----------------------------------------------------------------------------
# Parameter init (PyTorch nn.Linear-style) + packing into fused/padded buffers.
# -----------------------------------------------------------------------------
def init_params(key, market_features, confidence_features, hidden_dim):
    assert hidden_dim % 2 == 0, "hidden_dim must be even (two half-width branches)"
    h2 = hidden_dim // 2

    def linear(k, fan_in, fan_out):
        kw, kb = jax.random.split(k)
        bound = 1.0 / jnp.sqrt(float(fan_in))
        w = jax.random.uniform(kw, (fan_in, fan_out), jnp.float32, -bound, bound)
        b = jax.random.uniform(kb, (fan_out,), jnp.float32, -bound, bound)
        return w, b

    keys = jax.random.split(key, 6)
    w_m1, b_m1 = linear(keys[0], market_features, h2)
    w_m2, b_m2 = linear(keys[1], h2, h2)
    w_c1, b_c1 = linear(keys[2], confidence_features, h2)
    w_c2, b_c2 = linear(keys[3], h2, h2)
    w_cm1, b_cm1 = linear(keys[4], hidden_dim, hidden_dim)
    w_cm2, b_cm2 = linear(keys[5], hidden_dim, hidden_dim)
    return dict(w_m1=w_m1, b_m1=b_m1, w_m2=w_m2, b_m2=b_m2,
                w_c1=w_c1, b_c1=b_c1, w_c2=w_c2, b_c2=b_c2,
                w_cm1=w_cm1, b_cm1=b_cm1, w_cm2=w_cm2, b_cm2=b_cm2)


def pack_params(params, market_features, confidence_features, hidden_dim,
                compute_dtype=jnp.bfloat16, lane=LANE):
    """Build block-diagonal, lane-padded, pre-cast weight/bias buffers (once)."""
    h2 = hidden_dim // 2
    hp = _round_up(hidden_dim, lane)           # lane-dense hidden width
    cd = jnp.dtype(compute_dtype)

    # Layer 1 split into the market and confidence column blocks (no concat).
    w1m = jnp.zeros((market_features, hp), jnp.float32)
    w1m = w1m.at[:, :h2].set(params["w_m1"])
    w1c = jnp.zeros((confidence_features, hp), jnp.float32)
    w1c = w1c.at[:, h2:hidden_dim].set(params["w_c1"])

    w2 = jnp.zeros((hp, hp), jnp.float32)      # block-diag branch layer 2
    w2 = w2.at[:h2, :h2].set(params["w_m2"])
    w2 = w2.at[h2:hidden_dim, h2:hidden_dim].set(params["w_c2"])

    w3 = jnp.zeros((hp, hp), jnp.float32)      # combined layer 1
    w3 = w3.at[:hidden_dim, :hidden_dim].set(params["w_cm1"])

    w4 = jnp.zeros((hp, hp), jnp.float32)      # combined layer 2
    w4 = w4.at[:hidden_dim, :hidden_dim].set(params["w_cm2"])

    b = jnp.zeros((4, hp), jnp.float32)        # one packed f32 bias buffer
    b = b.at[0, :h2].set(params["b_m1"]).at[0, h2:hidden_dim].set(params["b_c1"])
    b = b.at[1, :h2].set(params["b_m2"]).at[1, h2:hidden_dim].set(params["b_c2"])
    b = b.at[2, :hidden_dim].set(params["b_cm1"])
    b = b.at[3, :hidden_dim].set(params["b_cm2"])

    return dict(
        w1m=w1m.astype(cd), w1c=w1c.astype(cd), w2=w2.astype(cd),
        w3=w3.astype(cd), w4=w4.astype(cd), b=b,
        hidden_dim=hidden_dim, hp=hp,
        market_features=market_features, confidence_features=confidence_features,
        compute_dtype=cd)


# -----------------------------------------------------------------------------
# Batch tiling: multiple of the sublane granularity, big tiles, >=2 grid steps
# whenever possible (so "parallel" can shard across v7x's two TensorCores).
# -----------------------------------------------------------------------------
def _pick_batch_tiling(batch, block_batch, sub):
    tb = _round_up(max(1, min(block_batch, batch)), sub)
    b_pad = _round_up(batch, tb)
    if b_pad // tb < 2:
        half = b_pad // 2
        if half >= sub and half % sub == 0:
            tb = half
        elif b_pad > sub:
            tb = sub
        b_pad = _round_up(batch, tb)
    return tb, b_pad


# -----------------------------------------------------------------------------
# Wrapper: batch grid, resident weights, lane-dense (and narrow-dtype) output.
# -----------------------------------------------------------------------------
def market_state_encoder(packed, market, confidence, *,
                         block_batch=2048, out_dtype=jnp.bfloat16):
    cd = packed["compute_dtype"]
    hidden_dim, hp = packed["hidden_dim"], packed["hp"]
    mf, cf = packed["market_features"], packed["confidence_features"]
    w1m, w1c, w2, w3, w4, b = (packed["w1m"], packed["w1c"], packed["w2"],
                               packed["w3"], packed["w4"], packed["b"])
    out_dtype = jnp.dtype(out_dtype)
    batch = market.shape[0]

    xm = market.astype(jnp.float32)
    xc = confidence.astype(jnp.float32)

    # Sublane granularity for the batch tile: 8 for f32 output, 16 for 16-bit.
    sub = 8 if out_dtype.itemsize >= 4 else 16
    tb, b_pad = _pick_batch_tiling(batch, block_batch, sub)
    if b_pad != batch:
        pad = ((0, b_pad - batch), (0, 0))
        xm = jnp.pad(xm, pad)
        xc = jnp.pad(xc, pad)
    grid = (b_pad // tb,)

    def resident(arr):
        # Constant index_map -> the block is fetched once and stays in VMEM.
        # TODO(synk): pipeline_mode=pl.Buffered(1) would halve resident-weight
        # VMEM for large hidden_dim on v7x once single-buffering is verified.
        return pl.BlockSpec(arr.shape, lambda i: (0, 0))

    # VMEM budget: double-buffered IO tiles + resident weights + activations,
    # with 2x headroom, clamped to a range that is safe on v5e/v6e/v7x.
    io_bytes = 2 * tb * (mf + cf) * 4 + 2 * tb * hp * out_dtype.itemsize
    w_bytes = 2 * ((mf + cf + 3 * hp) * hp * cd.itemsize + 4 * hp * 4)
    act_bytes = 4 * tb * hp * 4
    vmem_limit = int(min(max(2 * (io_bytes + w_bytes + act_bytes), 32 << 20),
                         48 << 20))

    cost = pl.CostEstimate(
        flops=2 * b_pad * (mf + cf + 3 * hp) * hp,
        transcendentals=0,
        bytes_accessed=int(b_pad * (mf + cf) * 4
                           + b_pad * hp * out_dtype.itemsize
                           + (mf + cf + 3 * hp) * hp * cd.itemsize
                           + 4 * hp * 4),
    )

    kernel = functools.partial(_encoder_kernel, compute_dtype=cd)
    out = pl.pallas_call(
        kernel,
        out_shape=jax.ShapeDtypeStruct((b_pad, hp), out_dtype),
        grid=grid,
        in_specs=[
            pl.BlockSpec((tb, mf), lambda i: (i, 0)),   # market batch tile
            pl.BlockSpec((tb, cf), lambda i: (i, 0)),   # confidence batch tile
            resident(w1m), resident(w1c), resident(w2), resident(w3),
            resident(w4), resident(b),
        ],
        out_specs=pl.BlockSpec((tb, hp), lambda i: (i, 0)),
        compiler_params=pltpu.CompilerParams(
            dimension_semantics=("parallel",),           # megacore on v7x
            vmem_limit_bytes=vmem_limit,
        ),
        cost_estimate=cost,
    )(xm, xc, w1m, w1c, w2, w3, w4, b)

    # Strip batch padding and the lane padding of the output.
    return out[:batch, :hidden_dim]


# -----------------------------------------------------------------------------
# Pure-JAX reference (mirrors the PyTorch module exactly, f32 throughout).
# -----------------------------------------------------------------------------
def market_state_encoder_ref(params, m, c):
    relu = lambda x: jnp.maximum(x, 0.0)
    h_m = relu(m @ params["w_m1"] + params["b_m1"])
    h_m = relu(h_m @ params["w_m2"] + params["b_m2"])
    h_c = relu(c @ params["w_c1"] + params["b_c1"])
    h_c = relu(h_c @ params["w_c2"] + params["b_c2"])
    comb = jnp.concatenate([h_m, h_c], axis=-1)
    h = relu(comb @ params["w_cm1"] + params["b_cm1"])
    return h @ params["w_cm2"] + params["b_cm2"]


if __name__ == "__main__":
    BATCH = 16
    MARKET_FEATURES = 16
    CONFIDENCE_FEATURES = 8
    HIDDEN_DIM = 32

    key = jax.random.PRNGKey(0)
    k_m, k_c, k_p = jax.random.split(key, 3)

    market = jax.random.normal(k_m, (BATCH, MARKET_FEATURES), jnp.float32)
    confidence = jax.random.normal(k_c, (BATCH, CONFIDENCE_FEATURES), jnp.float32)

    params = init_params(k_p, MARKET_FEATURES, CONFIDENCE_FEATURES, HIDDEN_DIM)
    ref = market_state_encoder_ref(params, market, confidence)

    # --- Strict parity path: f32 operands, f32 output (bit-level PyTorch parity).
    packed_f32 = pack_params(params, MARKET_FEATURES, CONFIDENCE_FEATURES,
                             HIDDEN_DIM, compute_dtype=jnp.float32)
    out_f32 = market_state_encoder(packed_f32, market, confidence,
                                   out_dtype=jnp.float32)
    out_f32 = jax.block_until_ready(out_f32)
    assert out_f32.shape == (BATCH, HIDDEN_DIM)
    assert jnp.allclose(out_f32, ref, atol=1e-4, rtol=1e-4)

    # --- Default fast path: bf16 MXU operands + bf16 output, f32 accumulation.
    packed_bf16 = pack_params(params, MARKET_FEATURES, CONFIDENCE_FEATURES,
                              HIDDEN_DIM, compute_dtype=jnp.bfloat16)
    out_bf16 = market_state_encoder(packed_bf16, market, confidence)
    out_bf16 = jax.block_until_ready(out_bf16)
    assert out_bf16.shape == (BATCH, HIDDEN_DIM)
    assert jnp.allclose(out_bf16.astype(jnp.float32), ref, atol=1e-1, rtol=1e-1)

    print("KERNEL_OK")
</pallas_src>

<mosaic_0001>
module attributes {stable_mosaic.version = 11 : i64} {
  func.func @_encoder_kernel(%arg0: i32, %arg1: memref<8x16xf32, #tpu.memory_space<vmem>>, %arg2: memref<8x8xf32, #tpu.memory_space<vmem>>, %arg3: memref<16x128xf32, #tpu.memory_space<vmem>>, %arg4: memref<8x128xf32, #tpu.memory_space<vmem>>, %arg5: memref<128x128xf32, #tpu.memory_space<vmem>>, %arg6: memref<128x128xf32, #tpu.memory_space<vmem>>, %arg7: memref<128x128xf32, #tpu.memory_space<vmem>>, %arg8: memref<4x128xf32, #tpu.memory_space<vmem>>, %arg9: memref<8x128xf32, #tpu.memory_space<vmem>>) attributes {dimension_semantics = [#tpu.dimension_semantics<parallel>], iteration_bounds = array<i64: 2>, scalar_prefetch = 0 : i64, scratch_operands = 0 : i64, tpu.core_type = #tpu.core_type<tc>, window_params = [{transform_indices = @transform_0, window_bounds = array<i64: 8, 16>}, {transform_indices = @transform_1, window_bounds = array<i64: 8, 8>}, {pipeline_mode = #tpu.pipeline_mode<synchronous>, transform_indices = @transform_2, window_bounds = array<i64: 16, 128>}, {pipeline_mode = #tpu.pipeline_mode<synchronous>, transform_indices = @transform_3, window_bounds = array<i64: 8, 128>}, {pipeline_mode = #tpu.pipeline_mode<synchronous>, transform_indices = @transform_4, window_bounds = array<i64: 128, 128>}, {pipeline_mode = #tpu.pipeline_mode<synchronous>, transform_indices = @transform_5, window_bounds = array<i64: 128, 128>}, {pipeline_mode = #tpu.pipeline_mode<synchronous>, transform_indices = @transform_6, window_bounds = array<i64: 128, 128>}, {pipeline_mode = #tpu.pipeline_mode<synchronous>, transform_indices = @transform_7, window_bounds = array<i64: 4, 128>}, {transform_indices = @transform_8, window_bounds = array<i64: 8, 128>}]} {
    %c0 = arith.constant 0 : index
    %c0_0 = arith.constant 0 : index
    %0 = vector.load %arg8[%c0, %c0_0] : memref<4x128xf32, #tpu.memory_space<vmem>>, vector<4x128xf32>
    %c0_1 = arith.constant 0 : index
    %c0_2 = arith.constant 0 : index
    %1 = vector.load %arg1[%c0_1, %c0_2] : memref<8x16xf32, #tpu.memory_space<vmem>>, vector<8x16xf32>
    %c0_3 = arith.constant 0 : index
    %c0_4 = arith.constant 0 : index
    %2 = vector.load %arg3[%c0_3, %c0_4] : memref<16x128xf32, #tpu.memory_space<vmem>>, vector<16x128xf32>
    %cst = arith.constant dense<0.000000e+00> : vector<8x128xf32>
    %3 = tpu.matmul %1, %2, %cst {dimension_numbers = #tpu.dot_dimension_numbers<[1], [0], [0], [1], [0, 0, 1, 1], [], []>} : vector<8x16xf32>, vector<16x128xf32>, vector<8x128xf32> -> vector<8x128xf32>
    %c0_5 = arith.constant 0 : index
    %c0_6 = arith.constant 0 : index
    %4 = vector.load %arg2[%c0_5, %c0_6] : memref<8x8xf32, #tpu.memory_space<vmem>>, vector<8x8xf32>
    %c0_7 = arith.constant 0 : index
    %c0_8 = arith.constant 0 : index
    %5 = vector.load %arg4[%c0_7, %c0_8] : memref<8x128xf32, #tpu.memory_space<vmem>>, vector<8x128xf32>
    %cst_9 = arith.constant dense<0.000000e+00> : vector<8x128xf32>
    %6 = tpu.matmul %4, %5, %cst_9 {dimension_numbers = #tpu.dot_dimension_numbers<[1], [0], [0], [1], [0, 0, 1, 1], [], []>} : vector<8x8xf32>, vector<8x128xf32>, vector<8x128xf32> -> vector<8x128xf32>
    %7 = arith.addf %3, %6 : vector<8x128xf32>
    %8 = vector.extract_strided_slice %0 {offsets = [0, 0], sizes = [1, 128], strides = [1, 1]} : vector<4x128xf32> to vector<1x128xf32>
    %9 = vector.broadcast %8 : vector<1x128xf32> to vector<8x128xf32>
    %10 = arith.addf %7, %9 : vector<8x128xf32>
    %cst_10 = arith.constant 0.000000e+00 : f32
    %11 = vector.broadcast %cst_10 : f32 to vector<8x128xf32>
    %12 = arith.maximumf %10, %11 : vector<8x128xf32>
    %c0_11 = arith.constant 0 : index
    %c0_12 = arith.constant 0 : index
    %13 = vector.load %arg5[%c0_11, %c0_12] : memref<128x128xf32, #tpu.memory_space<vmem>>, vector<128x128xf32>
    %cst_13 = arith.constant dense<0.000000e+00> : vector<8x128xf32>
    %14 = tpu.matmul %12, %13, %cst_13 {dimension_numbers = #tpu.dot_dimension_numbers<[1], [0], [0], [1], [0, 0, 1, 1], [], []>} : vector<8x128xf32>, vector<128x128xf32>, vector<8x128xf32> -> vector<8x128xf32>
    %15 = vector.extract_strided_slice %0 {offsets = [1, 0], sizes = [1, 128], strides = [1, 1]} : vector<4x128xf32> to vector<1x128xf32>
    %16 = vector.broadcast %15 : vector<1x128xf32> to vector<8x128xf32>
    %17 = arith.addf %14, %16 : vector<8x128xf32>
    %cst_14 = arith.constant 0.000000e+00 : f32
    %18 = vector.broadcast %cst_14 : f32 to vector<8x128xf32>
    %19 = arith.maximumf %17, %18 : vector<8x128xf32>
    %c0_15 = arith.constant 0 : index
    %c0_16 = arith.constant 0 : index
    %20 = vector.load %arg6[%c0_15, %c0_16] : memref<128x128xf32, #tpu.memory_space<vmem>>, vector<128x128xf32>
    %cst_17 = arith.constant dense<0.000000e+00> : vector<8x128xf32>
    %21 = tpu.matmul %19, %20, %cst_17 {dimension_numbers = #tpu.dot_dimension_numbers<[1], [0], [0], [1], [0, 0, 1, 1], [], []>} : vector<8x128xf32>, vector<128x128xf32>, vector<8x128xf32> -> vector<8x128xf32>
    %22 = vector.extract_strided_slice %0 {offsets = [2, 0], sizes = [1, 128], strides = [1, 1]} : vector<4x128xf32> to vector<1x128xf32>
    %23 = vector.broadcast %22 : vector<1x128xf32> to vector<8x128xf32>
    %24 = arith.addf %21, %23 : vector<8x128xf32>
    %cst_18 = arith.constant 0.000000e+00 : f32
    %25 = vector.broadcast %cst_18 : f32 to vector<8x128xf32>
    %26 = arith.maximumf %24, %25 : vector<8x128xf32>
    %c0_19 = arith.constant 0 : index
    %c0_20 = arith.constant 0 : index
    %27 = vector.load %arg7[%c0_19, %c0_20] : memref<128x128xf32, #tpu.memory_space<vmem>>, vector<128x128xf32>
    %cst_21 = arith.constant dense<0.000000e+00> : vector<8x128xf32>
    %28 = tpu.matmul %26, %27, %cst_21 {dimension_numbers = #tpu.dot_dimension_numbers<[1], [0], [0], [1], [0, 0, 1, 1], [], []>} : vector<8x128xf32>, vector<128x128xf32>, vector<8x128xf32> -> vector<8x128xf32>
    %29 = vector.extract_strided_slice %0 {offsets = [3, 0], sizes = [1, 128], strides = [1, 1]} : vector<4x128xf32> to vector<1x128xf32>
    %30 = vector.broadcast %29 : vector<1x128xf32> to vector<8x128xf32>
    %31 = arith.addf %28, %30 : vector<8x128xf32>
    %c0_22 = arith.constant 0 : index
    %c0_23 = arith.constant 0 : index
    %32 = vector.load %arg9[%c0_22, %c0_23] : memref<8x128xf32, #tpu.memory_space<vmem>>, vector<8x128xf32>
    tpu.vector_store %arg9[%c0_22, %c0_23], %31 {strides = array<i32>} : memref<8x128xf32, #tpu.memory_space<vmem>>, vector<8x128xf32>,
    return
  }
  func.func @transform_0(%arg0: i32) -> (i32, i32) {
    %c0_i32 = arith.constant 0 : i32
    %c0_i32_0 = arith.constant 0 : i32
    return %arg0, %c0_i32 : i32, i32
  }
  func.func @transform_1(%arg0: i32) -> (i32, i32) {
    %c0_i32 = arith.constant 0 : i32
    %c0_i32_0 = arith.constant 0 : i32
    return %arg0, %c0_i32 : i32, i32
  }
  func.func @transform_2(%arg0: i32) -> (i32, i32) {
    %c0_i32 = arith.constant 0 : i32
    %c0_i32_0 = arith.constant 0 : i32
    %c0_i32_1 = arith.constant 0 : i32
    return %c0_i32, %c0_i32_0 : i32, i32
  }
  func.func @transform_3(%arg0: i32) -> (i32, i32) {
    %c0_i32 = arith.constant 0 : i32
    %c0_i32_0 = arith.constant 0 : i32
    %c0_i32_1 = arith.constant 0 : i32
    return %c0_i32, %c0_i32_0 : i32, i32
  }
  func.func @transform_4(%arg0: i32) -> (i32, i32) {
    %c0_i32 = arith.constant 0 : i32
    %c0_i32_0 = arith.constant 0 : i32
    %c0_i32_1 = arith.constant 0 : i32
    return %c0_i32, %c0_i32_0 : i32, i32
  }
  func.func @transform_5(%arg0: i32) -> (i32, i32) {
    %c0_i32 = arith.constant 0 : i32
    %c0_i32_0 = arith.constant 0 : i32
    %c0_i32_1 = arith.constant 0 : i32
    return %c0_i32, %c0_i32_0 : i32, i32
  }
  func.func @transform_6(%arg0: i32) -> (i32, i32) {
    %c0_i32 = arith.constant 0 : i32
    %c0_i32_0 = arith.constant 0 : i32
    %c0_i32_1 = arith.constant 0 : i32
    return %c0_i32, %c0_i32_0 : i32, i32
  }
  func.func @transform_7(%arg0: i32) -> (i32, i32) {
    %c0_i32 = arith.constant 0 : i32
    %c0_i32_0 = arith.constant 0 : i32
    %c0_i32_1 = arith.constant 0 : i32
    return %c0_i32, %c0_i32_0 : i32, i32
  }
  func.func @transform_8(%arg0: i32) -> (i32, i32) {
    %c0_i32 = arith.constant 0 : i32
    %c0_i32_0 = arith.constant 0 : i32
    return %arg0, %c0_i32 : i32, i32
  }
}

</mosaic_0001>

<bundles_post_ra>
// kernel: tpu_custom_call.1
= control target key start
LH: loop header
LB: loop body
LE: loop exit
PB: predicated region body
PF: predicated region fallthrough
CT: control target
= control target key end

     0   :  { %13 = vsyncpa [#allocation3], 0  ;;  %s1824_s0 = inlined_call_operand.vmem [shape: f32[16,16], index: 0, kind: input, shape index: {}]   ;;  %s1825_s1 = inlined_call_operand.vmem [shape: f32[16,8], index: 1, kind: input, shape index: {}]   ;;  %s1826_s2 = inlined_call_operand.hbm [shape: f32[16,128], index: 2, kind: input, shape index: {}]   ;;  %s1827_s3 = inlined_call_operand.vmem [shape: f32[8,128], index: 3, kind: input, shape index: {}]   ;;  %s1828_s4 = inlined_call_operand.hbm [shape: f32[128,128], index: 4, kind: input, shape index: {}]   ;;  %s1829_s5 = inlined_call_operand.hbm [shape: f32[128,128], index: 5, kind: input, shape index: {}]   ;;  %s1830_s6 = inlined_call_operand.hbm [shape: f32[128,128], index: 6, kind: input, shape index: {}]   ;;  %s1831_s7 = inlined_call_operand.vmem [shape: f32[4,128], index: 7, kind: input, shape index: {}]   ;;  %s1832_s8 = inlined_call_operand.hbm [shape: f32[16,128], index: 8, kind: output, shape index: {}]  }
   0x1   :  { %14 = vsyncpa [#allocation6], 0 }
   0x2   :  { %15 = vsyncpa [#allocation9], 0 }
   0x3   :  { %16 = vsyncpa [#allocation4], 0 }
   0x4   :  { %18 = vsyncpa [#allocation4 + $0x1], 0  ;;  %s1533_s27 = smov 0   ;;  %s1535_s28 = smov 0  }
   0x5   :  { %s1537_s29 = smov 0   ;;  %s1539_s30 = smov 0  }
   0x6 LB: > { %1840 = sst [smem:[#allocation15_spill]] %s1472_s29  ;;  %s1554_s9 = sadd.s32 4294967295, %s1476_s30   ;;  %s1476_s30 = sphi %s1539_s30, %s1859_s30   ;;  %s1472_s29 = sphi %s1537_s29, %s1861_s29   ;;  %s1468_s28 = sphi %s1535_s28, %s1863_s28   ;;  %s1464_s27 = sphi %s1533_s27, %s1862_s27  }
   0x7   : > { %s936_s10 = sadd.s32 4294967294, %s1476_s30   ;;  %s1558_s11 = sadd.s32 1, %s1476_s30  }
   0x8   : > { %1841 = sst [smem:[#allocation16_spill]] %s1558_s11  ;;  %s209_s12 = sadd.s32 1, %s1472_s29 }
   0x9   : > { %s206_s13 = ssub.s32 %s1476_s30, %s1558_s11  ;;  %p219_p0 = scmp.ne.s32.totalorder %s1472_s29, %s1468_s28 }
   0xa   : > { %p207_p1 = scmp.eq.s32.totalorder %s206_s13, 0  ;;  %p220_p2 = scmp.eq.s32.totalorder %s1554_s9, 1 }
   0xb   : > { %p225_p3 = scmp.ne.s32.totalorder %s1468_s28, %s1464_s27  ;;  %p226_p4 = scmp.eq.s32.totalorder %s936_s10, 1 }
   0xc   : > { %s1569_s14 = scalar_select %p207_p1, %s1472_s29, %s209_s12  }
   0xd   : > { %p1571_p5 = por %p220_p2, %p219_p0  ;;  %p1575_p6 = por %p226_p4, %p225_p3 }
   0xe   : > { %1842 = sst [smem:[#allocation17_spill]] %s1569_s14  ;;  %p937_p7 = scmp.ge.s32.totalorder %s1476_s30, 1 }
   0xf   : > { %s1843_s15 = scalar_select %p1571_p5, 1, 0 }
  0x10   : > { %s1844_s16 = scalar_select %p1575_p6, 1, 0 }
  0x11   : > { %p233_p8 = scmp.lt.s32.totalorder %s1476_s30, 3  ;;  %p1833_p9 = scmp.eq.s32.totalorder %s1554_s9, 0 }
  0x12   : > { %1845 = sst [smem:[#allocation18_spill]] %s1844_s16  ;;  %s1478_s18 = smov [#allocation5]  }
  0x13   : > { %p1582_p10 = pnand %p937_p7, %p233_p8  ;;  %s261_s19 = sshll.u32 %s1478_s18, 4  ;;  %s1588_s19 = int_to_ptr.vmem [resolvable:$true] %s261_s19 }
  0x14   : > { %s1479_s21 = smov [#allocation2]   ;;  %s1480_s23 = smov [#allocation7]  }
  0x15   : > { %s1846_s17 = scalar_select %p1582_p10, 1, 0 }
  0x16   : > { %p1223_p11 = pneg %p1582_p10  ;;  %s245_s22 = sshll.u32 %s1479_s21, 4  ;;  %s1596_s22 = int_to_ptr.vmem [resolvable:$true] %s245_s22 }
  0x17   : > { %s1598_s24 = sshll.u32 %s1480_s23, 4  ;;  %s1290_s10 = scalar_lea.hbm %s1828_s4, 2048  ;;  %s275_s24 = int_to_ptr.vmem [resolvable:$true] %s1598_s24 }
  0x18   : > { %p1592_p12 = pnand %p1833_p9, %p1223_p11  ;;  %p1291_p13 = scmp.ne.s32.totalorder %s1828_s4, %s1290_s10 }
  0x19   : > { %p1297_p3 = scmp.lt.u32.totalorder %s1290_s10, %s1828_s4 }
  0x1a   : > { %p1608_p0 = pneg %p1592_p12 }
  0x1c   : > { %p1293_p1 = pnand %p1608_p0, %p1291_p13 }
  0x1e   : > { %p1294_p2 = pneg %p1293_p1 }
  0x20   : > { %p1299_p4 = pnand %p1297_p3, %p1294_p2 }
  0x22   : > { %1302 = shalt.err (!%p1299_p4)
}
  0x23   : > { %s1303_s25 = scalar_lea.vmem %s1588_s19, 2048  ;;  %p1311_p9 = scmp.lt.s32.totalorder %s1588_s19, %s1588_s19 }
  0x24   : > { %p1304_p7 = scmp.ne.s32.totalorder %s1588_s19, %s1303_s25  ;;  %p1312_p6 = scmp.lt.s32.totalorder %s1303_s25, %s1303_s25 }
  0x26   : > { %p1306_p8 = pnand %p1304_p7, %p1608_p0  ;;  %p1313_p13 = por %p1312_p6, %p1311_p9 }
  0x28   : > { %p1307_p11 = pneg %p1306_p8 }
  0x2a   : > { %p1314_p1 = pnand %p1313_p13, %p1307_p11 }
  0x2c   : > { %1317 = shalt.err (!%p1314_p1)
}
  0x2d   : > { %s1481_s26 = smov 128   ;;  %s1482_s10 = smov 8  }
  0x2e   : > { %1229 = dma.hbm_to_vmem [thread:$0]  (!%p1592_p12), %s1828_s4, 2048, %s1588_s19, [#allocation6], %s1481_s26, %s1481_s26, %s1482_s10  }
  0x2f   : > { %s1318_s25 = scalar_lea.hbm %s1826_s2, 256 }
  0x30   : > { %p1319_p6 = scmp.ne.s32.totalorder %s1826_s2, %s1318_s25  ;;  %p1325_p3 = scmp.lt.u32.totalorder %s1318_s25, %s1826_s2 }
  0x32   : > { %p1321_p9 = pnand %p1319_p6, %p1608_p0 }
  0x34   : > { %p1322_p2 = pneg %p1321_p9 }
  0x36   : > { %p1327_p4 = pnand %p1325_p3, %p1322_p2 }
  0x38   : > { %1330 = shalt.err (!%p1327_p4)
}
  0x39   : > { %s1331_s19 = scalar_lea.vmem %s1596_s22, 256  ;;  %p1339_p13 = scmp.lt.s32.totalorder %s1596_s22, %s1596_s22 }
  0x3a   : > { %p1332_p7 = scmp.ne.s32.totalorder %s1596_s22, %s1331_s19  ;;  %p1340_p1 = scmp.lt.s32.totalorder %s1331_s19, %s1331_s19 }
  0x3c   : > { %p1334_p8 = pnand %p1332_p7, %p1608_p0  ;;  %p1341_p6 = por %p1340_p1, %p1339_p13 }
  0x3e   : > { %p1335_p11 = pneg %p1334_p8 }
  0x40   : > { %p1342_p9 = pnand %p1341_p6, %p1335_p11 }
  0x42   : > { %1345 = shalt.err (!%p1342_p9)
}
  0x43   : > { %1226 = dma.hbm_to_vmem [thread:$0]  (!%p1592_p12), %s1826_s2, 256, %s1596_s22, [#allocation3], %s1481_s26, %s1481_s26, %s1482_s10  }
  0x44   : > { %s1346_s12 = scalar_lea.hbm %s1829_s5, 2048 }
  0x45   : > { %p1347_p2 = scmp.ne.s32.totalorder %s1829_s5, %s1346_s12  ;;  %p1353_p7 = scmp.lt.u32.totalorder %s1346_s12, %s1829_s5 }
  0x47   : > { %p1349_p3 = pnand %p1347_p2, %p1608_p0 }
  0x49   : > { %p1350_p4 = pneg %p1349_p3 }
  0x4b   : > { %p1355_p8 = pnand %p1353_p7, %p1350_p4 }
  0x4d   : > { %1358 = shalt.err (!%p1355_p8)
}
  0x4e   : > { %s1359_s19 = scalar_lea.vmem %s275_s24, 2048  ;;  %p1367_p6 = scmp.lt.s32.totalorder %s275_s24, %s275_s24 }
  0x4f   : > { %p1360_p11 = scmp.ne.s32.totalorder %s275_s24, %s1359_s19  ;;  %p1368_p9 = scmp.lt.s32.totalorder %s1359_s19, %s1359_s19 }
  0x51   : > { %p1362_p13 = pnand %p1360_p11, %p1608_p0  ;;  %p1369_p5 = por %p1368_p9, %p1367_p6 }
  0x53   : > { %p1363_p1 = pneg %p1362_p13 }
  0x55   : > { %p1370_p10 = pnand %p1369_p5, %p1363_p1 }
  0x57   : > { %1373 = shalt.err (!%p1370_p10)
}
  0x58   : > { %1232 = dma.hbm_to_vmem [thread:$0]  (!%p1592_p12), %s1829_s5, 2048, %s275_s24, [#allocation6], %s1481_s26, %s1481_s26, %s1482_s10  }
  0x59   : > { %s1483_s11 = smov [#allocation8]   ;;  %s1374_s13 = scalar_lea.hbm %s1830_s6, 2048 }
  0x5a   : > { %s287_s14 = sshll.u32 %s1483_s11, 4  ;;  %p1375_p5 = scmp.ne.s32.totalorder %s1830_s6, %s1374_s13  ;;  %s288_s14 = int_to_ptr.vmem [resolvable:$true] %s287_s14 }
  0x5b   : > { %p1381_p3 = scmp.lt.u32.totalorder %s1374_s13, %s1830_s6 }
  0x5c   : > { %p1377_p10 = pnand %p1375_p5, %p1608_p0 }
  0x5e   : > { %p1378_p2 = pneg %p1377_p10 }
  0x60   : > { %p1383_p4 = pnand %p1381_p3, %p1378_p2 }
  0x62   : > { %1386 = shalt.err (!%p1383_p4)
}
  0x63   : > { %s1387_s24 = scalar_lea.vmem %s288_s14, 2048  ;;  %p1395_p13 = scmp.lt.s32.totalorder %s288_s14, %s288_s14 }
  0x64   : > { %p1388_p7 = scmp.ne.s32.totalorder %s288_s14, %s1387_s24  ;;  %p1396_p1 = scmp.lt.s32.totalorder %s1387_s24, %s1387_s24 }
  0x66   : > { %p1390_p8 = pnand %p1388_p7, %p1608_p0  ;;  %p1397_p6 = por %p1396_p1, %p1395_p13 }
  0x68   : > { %p1391_p11 = pneg %p1390_p8 }
  0x6a   : > { %p1398_p9 = pnand %p1397_p6, %p1391_p11 }
  0x6c   : > { %1401 = shalt.err (!%p1398_p9)
}
  0x6d   : > { %1235 = dma.hbm_to_vmem [thread:$0]  (!%p1592_p12), %s1830_s6, 2048, %s288_s14, [#allocation9], %s1481_s26, %s1481_s26, %s1482_s10  }
  0x6e   : > { %p1849_p5 = scmp.ne.s32.totalorder %s1846_s17, 0 }
  0x6f   : > { %p1850_p0 = scmp.eq.s32.totalorder (!%p1849_p5), %s1554_s9, 0 }
  0x70   : > { %320 = sbr.rel (%p1849_p5) target bundleno = 1015 (0x3f7), region = 52 }
  0x77   : > { %1447 = dma.done.wait (%p1850_p0), [#allocation3], 256   ;;  %p1851_p10 = pmov %p1850_p0 }
  0x78   : > { %p1852_p2 = pmov %p1850_p0 }
  0x79   : > { %1449 = vsyncadd (%p1851_p10), [#allocation3], 4294967040 }
  0x7a   : > { %1451 = dma.done.wait (%p1852_p2), [#allocation6], 4096   ;;  %p1853_p3 = pmov %p1850_p0 }
  0x7b   : > { %p1854_p4 = pmov %p1850_p0 }
  0x7c   : > { %1453 = vsyncadd (%p1853_p3), [#allocation6], 4294963200 }
  0x7d   : > { %1455 = dma.done.wait (%p1854_p4), [#allocation9], 2048   ;;  %p1855_p12 = pmov %p1850_p0 }
  0x7e   : > { %p369_p7 = scmp.lt.s32.totalorder %s1554_s9, 1  ;;  %v1484_v0 = vmov 0.0   ;;  %vm1485_vm0 = vmmov 0   ;;  %v1486_v1 = vmov 0.0|0.0   ;;  %vm383_vm1 = vcmask 64512   ;;  %v382_v2 = vld [vmem:[%s1827_s3] sm:$0xff] }
  0x7f   : > { %1457 = vsyncadd (%p1855_p12), [#allocation9], 4294965248  ;;  %1013 = vmatprep.subr.mxu1 %v1484_v0  ;;  %1015 = vmatprep.mubr.msk.f32.mxu1 %vm1485_vm0, %v1484_v0  ;;  %v379_v4 = vld [vmem:[#allocation2] sm:$0xff]  ;;  %v380_v5 = vld [vmem:[#allocation2 + $0x8] sm:$0xff]  ;;  %vm457_vm2 = vcmask 130048   ;;  %v531_v53 = vlaneseq  ;;  %s366_s25 = sand.u32 1, %s1468_s28  }
  0x80   : > { %s370_s17 = scalar_select %p369_p7, %s1554_s9, 1  ;;  %1133 = vmatprep.subr.bf16.mxu0 %v1486_v1  ;;  %1057 = vmatprep.mubr.msk.f32.mxu0 %vm1485_vm0, %v1484_v0  ;;  %v537_v6 = vld [vmem:[#allocation5] sm:$0xff]  ;;  %v1131_v7 = vpack.c.bf16 %v380_v5, %v379_v4  ;;  %v538_v8 = vld [vmem:[#allocation5 + $0x8] sm:$0xff]  ;;  %v539_v9 = vld [vmem:[#allocation5 + $0x10] sm:$0xff] }
  0x81   : > { %1014 = vmatpush3.msra.mxu1 %v382_v2  ;;  %v540_v10 = vld [vmem:[#allocation5 + $0x18] sm:$0xff]  ;;  %v1134_v11 = vpack.c.bf16 %v538_v8, %v537_v6  ;;  %v541_v14 = vld [vmem:[#allocation5 + $0x20] sm:$0xff]  ;;  %v542_v15 = vld [vmem:[#allocation5 + $0x28] sm:$0xff]  ;;  %v1753_v54 = vshrl.u32 %v531_v53, 7  ;;  %s948_s19 = sshll.u32 %s366_s25, 3  ;;  %s954_s24 = sshll.u32 %s1554_s9, 7 }
  0x82   : > { %s949_s20 = sshll.u32 %s370_s17, 3  ;;  %1130 = vmatprep.subr.bf16.mxu1 %v1486_v1  ;;  %v1137_v13 = vpack.c.bf16 %v540_v10, %v539_v9  ;;  %v1140_v16 = vpack.c.bf16 %v542_v15, %v541_v14  ;;  %v543_v17 = vld [vmem:[#allocation5 + $0x30] sm:$0xff]  ;;  %v544_v18 = vld [vmem:[#allocation5 + $0x38] sm:$0xff]  ;;  %v545_v20 = vld [vmem:[#allocation5 + $0x40] sm:$0xff]  ;;  %s368_s22 = scalar_lea.vmem [#allocation10], %s948_s19 }
  0x83   : > { %s376_s10 = scalar_lea.vmem %s1825_s1, %s949_s20  ;;  %s372_s13 = scalar_lea.vmem %s1824_s0, %s949_s20  ;;  %1135 = vmatpush3.bf16.msra.mxu0 %v1134_v11  ;;  %v1143_v19 = vpack.c.bf16 %v544_v18, %v543_v17  ;;  %v546_v21 = vld [vmem:[#allocation5 + $0x48] sm:$0xff]  ;;  %v547_v23 = vld [vmem:[#allocation5 + $0x50] sm:$0xff]  ;;  %v548_v24 = vld [vmem:[#allocation5 + $0x58] sm:$0xff]  ;;  %v533_v56 = vsub.s32 0, %v1753_v54 }
  0x84   : > { %v381_v3 = vld [vmem:[%s376_s10] sm:$0xff]  ;;  %1136 = vmatprep.subr.bf16.mxu0 %v1486_v1  ;;  %v1146_v22 = vpack.c.bf16 %v546_v21, %v545_v20  ;;  %v1149_v25 = vpack.c.bf16 %v548_v24, %v547_v23  ;;  %v549_v26 = vld [vmem:[#allocation5 + $0x60] sm:$0xff]  ;;  %v550_v27 = vld [vmem:[#allocation5 + $0x68] sm:$0xff]  ;;  %s824_s29 = sshll.u32 %s368_s22, 4  ;;  %s1782_s18 = scalar_lea.hbm %s1832_s8, %s954_s24  ;;  %s1784_s29 = int_to_ptr.vmem [resolvable:$true] %s824_s29 }
  0x85   : > { %1016 = vmatmul.mubr.msk.f32.vlgmr.msra.gmra.mrb[0].mxu1 %vm383_vm1, %v381_v3  ;;  %v378_v12 = vld [vmem:[%s372_s13] sm:$0xff]  ;;  %v1152_v28 = vpack.c.bf16 %v550_v27, %v549_v26  ;;  %v552_v30 = vld [vmem:[#allocation5 + $0x78] sm:$0xff]  ;;  %v628_v32 = vld [vmem:[#allocation7] sm:$0xff]  ;;  %v555_v26 = vsub.s32 1, %v1753_v54  ;;  %s811_s26 = scalar_lea.sflag [#allocation4], %s366_s25  ;;  %s1402_s10 = scalar_lea.vmem %s1784_s29, 128 }
  0x86   : > { %1022 = vmatprep.mubr.msk.f32.mxu1 %vm1485_vm0, %v1484_v0  ;;  %1132 = vmatpush3.bf16.msra.mxu1 %v1131_v7  ;;  %v551_v29 = vld [vmem:[#allocation5 + $0x70] sm:$0xff]  ;;  %v629_v33 = vld [vmem:[#allocation7 + $0x8] sm:$0xff]  ;;  %v631_v36 = vld [vmem:[#allocation7 + $0x18] sm:$0xff]  ;;  %p1403_p8 = scmp.ne.s32.totalorder %s1784_s29, %s1402_s10  ;;  %p1856_p11 = scmp.ne.s32.totalorder %s1843_s15, 0 }
  0x87   : > { %1157 = vmatprep.subr.bf16.mxu1 %v1486_v1  ;;  %1138 = vmatpush3.bf16.msra.mxu0 %v1137_v13  ;;  %v1155_v31 = vpack.c.bf16 %v552_v30, %v551_v29  ;;  %v630_v34 = vld [vmem:[#allocation7 + $0x10] sm:$0xff]  ;;  %v1158_v35 = vpack.c.bf16 %v629_v33, %v628_v32  ;;  %v632_v38 = vld [vmem:[#allocation7 + $0x20] sm:$0xff]  ;;  %v633_v39 = vld [vmem:[#allocation7 + $0x28] sm:$0xff]  ;;  %s1487_s9 = smov [#allocation10]  }
  0x88   : > { %1139 = vmatprep.subr.bf16.mxu0 %v1486_v1  ;;  %v1161_v37 = vpack.c.bf16 %v631_v36, %v630_v34  ;;  %v1164_v40 = vpack.c.bf16 %v633_v39, %v632_v38  ;;  %v634_v41 = vld [vmem:[#allocation7 + $0x30] sm:$0xff]  ;;  %v635_v42 = vld [vmem:[#allocation7 + $0x38] sm:$0xff]  ;;  %v636_v44 = vld [vmem:[#allocation7 + $0x40] sm:$0xff]  ;;  %p1404_p13 = pnand %p1403_p8, %p1856_p11  ;;  %s1406_s11 = sshll.u32 %s1487_s9, 4  ;;  %s1407_s11 = int_to_ptr.vmem [resolvable:$false] %s1406_s11 }
  0x89   : > { %1023 = vmatmul.mubr.msk.f32.vlgmr.msra.gmra.mrb[2].mxu1 %vm457_vm2, %v378_v12  ;;  %v1167_v43 = vpack.c.bf16 %v635_v42, %v634_v41  ;;  %v637_v45 = vld [vmem:[#allocation7 + $0x48] sm:$0xff]  ;;  %v638_v47 = vld [vmem:[#allocation7 + $0x50] sm:$0xff]  ;;  %v639_v48 = vld [vmem:[#allocation7 + $0x58] sm:$0xff]  ;;  %s1408_s14 = scalar_lea.vmem %s1407_s11, 256  ;;  %p1409_p6 = scmp.lt.s32.totalorder %s1784_s29, %s1407_s11 }
  0x8a   : > { %1092 = vmatprep.mubr.msk.f32.mxu1 %vm1485_vm0, %v1484_v0  ;;  %1159 = vmatpush3.bf16.msra.mxu1 %v1158_v35  ;;  %v1170_v46 = vpack.c.bf16 %v637_v45, %v636_v44  ;;  %v1173_v49 = vpack.c.bf16 %v639_v48, %v638_v47  ;;  %v640_v50 = vld [vmem:[#allocation7 + $0x60] sm:$0xff]  ;;  %v641_v51 = vld [vmem:[#allocation7 + $0x68] sm:$0xff]  ;;  %v1759_v58 = vld [vmem:[%s1831_s7] sm:$0xf]  ;;  %v646_v35 = vsub.s32 2, %v1753_v54  ;;  %p1405_p1 = pneg %p1404_p13  ;;  %p1410_p9 = scmp.lt.s32.totalorder %s1408_s14, %s1402_s10 }
  0x8b   : > { %1141 = vmatpush3.bf16.msra.mxu0 %v1140_v16  ;;  %1160 = vmatprep.subr.bf16.mxu1 %v1486_v1  ;;  %v1176_v52 = vpack.c.bf16 %v641_v51, %v640_v50  ;;  %v534_v59 = vrot.slane %v1759_v58, %v533_v56  ;;  %v642_v3 = vld [vmem:[#allocation7 + $0x70] sm:$0xff]  ;;  %v643_v4 = vld [vmem:[#allocation7 + $0x78] sm:$0xff]  ;;  %v719_v6 = vld [vmem:[#allocation8] sm:$0xff]  ;;  %v556_v27 = vrot.slane %v1759_v58, %v555_v26 }
  0x8c   : > { %1142 = vmatprep.subr.bf16.mxu0 %v1486_v1  ;;  %v1179_v5 = vpack.c.bf16 %v643_v4, %v642_v3  ;;  %v720_v7 = vld [vmem:[#allocation8 + $0x8] sm:$0xff]  ;;  %v721_v8 = vld [vmem:[#allocation8 + $0x10] sm:$0xff]  ;;  %v722_v10 = vld [vmem:[#allocation8 + $0x18] sm:$0xff]  ;;  %v647_v36 = vrot.slane %v1759_v58, %v646_v35  ;;  %p1411_p5 = por %p1410_p9, %p1409_p6 }
  0x8d   : > { %v1182_v9 = vpack.c.bf16 %v720_v7, %v719_v6  ;;  %v1185_v11 = vpack.c.bf16 %v722_v10, %v721_v8  ;;  %v723_v12 = vld [vmem:[#allocation8 + $0x20] sm:$0xff]  ;;  %v724_v13 = vld [vmem:[#allocation8 + $0x28] sm:$0xff]  ;;  %v726_v15 = vld [vmem:[#allocation8 + $0x38] sm:$0xff] }
  0x8e   : > { %1162 = vmatpush3.bf16.msra.mxu1 %v1161_v37  ;;  %v1188_v14 = vpack.c.bf16 %v724_v13, %v723_v12  ;;  %v727_v17 = vld [vmem:[#allocation8 + $0x40] sm:$0xff]  ;;  %v728_v18 = vld [vmem:[#allocation8 + $0x48] sm:$0xff]  ;;  %v729_v20 = vld [vmem:[#allocation8 + $0x50] sm:$0xff]  ;;  %p1412_p0 = pnand %p1411_p5, %p1405_p1 }
  0x8f   : > { %1144 = vmatpush3.bf16.msra.mxu0 %v1143_v19  ;;  %1163 = vmatprep.subr.bf16.mxu1 %v1486_v1  ;;  %v1194_v19 = vpack.c.bf16 %v728_v18, %v727_v17  ;;  %v730_v21 = vld [vmem:[#allocation8 + $0x58] sm:$0xff]  ;;  %v731_v23 = vld [vmem:[#allocation8 + $0x60] sm:$0xff]  ;;  %v732_v24 = vld [vmem:[#allocation8 + $0x68] sm:$0xff] }
  0x90   : > { %1145 = vmatprep.subr.bf16.mxu0 %v1486_v1  ;;  %v733_v32 = vld [vmem:[#allocation8 + $0x70] sm:$0xff]  ;;  %v734_v33 = vld [vmem:[#allocation8 + $0x78] sm:$0xff] }
  0x91   : > { %v1203_v34 = vpack.c.bf16 %v734_v33, %v733_v32 }
  0x92   : > { %1165 = vmatpush3.bf16.msra.mxu1 %v1164_v40  ;;  %v737_v40 = vsub.s32 3, %v1753_v54 }
  0x93   : > { %1147 = vmatpush3.bf16.msra.mxu0 %v1146_v22  ;;  %1166 = vmatprep.subr.bf16.mxu1 %v1486_v1  ;;  %v1197_v22 = vpack.c.bf16 %v730_v21, %v729_v20 }
  0x94   : > { %1148 = vmatprep.subr.bf16.mxu0 %v1486_v1  ;;  %v738_v41 = vrot.slane %v1759_v58, %v737_v40 }
  0x96   : > { %1168 = vmatpush3.bf16.msra.mxu1 %v1167_v43 }
  0x97   : > { %1150 = vmatpush3.bf16.msra.mxu0 %v1149_v25  ;;  %1169 = vmatprep.subr.bf16.mxu1 %v1486_v1  ;;  %v1200_v25 = vpack.c.bf16 %v732_v24, %v731_v23 }
  0x98   : > { %1151 = vmatprep.subr.bf16.mxu0 %v1486_v1 }
  0x9a   : > { %1171 = vmatpush3.bf16.msra.mxu1 %v1170_v46 }
  0x9b   : > { %1153 = vmatpush3.bf16.msra.mxu0 %v1152_v28  ;;  %1172 = vmatprep.subr.bf16.mxu1 %v1486_v1 }
  0x9c   : > { %1154 = vmatprep.subr.bf16.mxu0 %v1486_v1 }
  0x9e   : > { %1174 = vmatpush3.bf16.msra.mxu1 %v1173_v49 }
  0x9f   : > { %1156 = vmatpush3.bf16.msra.mxu0 %v1155_v31  ;;  %1175 = vmatprep.subr.bf16.mxu1 %v1486_v1 }
  0xa0   : > { %1181 = vmatprep.subr.bf16.mxu0 %v1486_v1 }
  0xa2   : > { %1177 = vmatpush3.bf16.msra.mxu1 %v1176_v52 }
  0xa3   : > { %1178 = vmatprep.subr.bf16.mxu1 %v1486_v1 }
  0xa6   : > { %1180 = vmatpush3.bf16.msra.mxu1 %v1179_v5 }
 0x158   : > { %v453_v55 = vpop.f32.mrb[0].mxu1 }
 0x159   : > { %v1017_v57 = vpop.f32.mrb[1].mxu1 }
 0x15c   : > { %v527_v60 = vpop.f32.mrb[2].mxu1 }
 0x15d   : > { %v528_v61 = vadd.f32 %v527_v60, %v453_v55  ;;  %v1024_v62 = vpop.f32.mrb[3].mxu1 }
 0x15f   : > { %v535_v63 = vadd.f32 %v534_v59, %v528_v61 }
 0x161   : > { %v536_v2 = vmax.f32 %v535_v63, 0.0 }
 0x163   : > { %1058 = vmatmul.mubr.f32.vlgmr.msra.gmra.mrb[0].mxu0 %v536_v2 }
 0x164   : > { %1127 = vmatprep.mubr.msk.f32.mxu0 %vm1485_vm0, %v1484_v0  ;;  %1183 = vmatpush3.bf16.msra.mxu0 %v1182_v9  ;;  %v725_v0 = vld [vmem:[#allocation8 + $0x30] sm:$0xff] }
 0x165   : > { %1184 = vmatprep.subr.bf16.mxu0 %v1486_v1  ;;  %v1191_v16 = vpack.c.bf16 %v726_v15, %v725_v0 }
 0x168   : > { %1186 = vmatpush3.bf16.msra.mxu0 %v1185_v11 }
 0x169   : > { %1187 = vmatprep.subr.bf16.mxu0 %v1486_v1 }
 0x16c   : > { %1189 = vmatpush3.bf16.msra.mxu0 %v1188_v14 }
 0x16d   : > { %1190 = vmatprep.subr.bf16.mxu0 %v1486_v1 }
 0x170   : > { %1192 = vmatpush3.bf16.msra.mxu0 %v1191_v16 }
 0x171   : > { %1193 = vmatprep.subr.bf16.mxu0 %v1486_v1 }
 0x174   : > { %1195 = vmatpush3.bf16.msra.mxu0 %v1194_v19 }
 0x175   : > { %1196 = vmatprep.subr.bf16.mxu0 %v1486_v1 }
 0x178   : > { %1198 = vmatpush3.bf16.msra.mxu0 %v1197_v22 }
 0x179   : > { %1199 = vmatprep.subr.bf16.mxu0 %v1486_v1 }
 0x17c   : > { %1201 = vmatpush3.bf16.msra.mxu0 %v1200_v25 }
 0x17d   : > { %1202 = vmatprep.subr.bf16.mxu0 %v1486_v1 }
 0x180   : > { %1204 = vmatpush3.bf16.msra.mxu0 %v1203_v34 }
 0x236   : > { %v623_v28 = vpop.f32.mrb[0].mxu0 }
 0x237   : > { %v624_v29 = vadd.f32 %v623_v28, %v556_v27  ;;  %v1059_v30 = vpop.f32.mrb[1].mxu0 }
 0x239   : > { %v627_v31 = vmax.f32 %v624_v29, 0.0 }
 0x23b   : > { %1093 = vmatmul.mubr.f32.vlgmr.msra.gmra.mrb[4].mxu1 %v627_v31 }
 0x30e   : > { %v714_v1 = vpop.f32.mrb[4].mxu1 }
 0x30f   : > { %v715_v37 = vadd.f32 %v714_v1, %v647_v36  ;;  %v1094_v38 = vpop.f32.mrb[5].mxu1 }
 0x311   : > { %v718_v39 = vmax.f32 %v715_v37, 0.0 }
 0x313   : > { %1128 = vmatmul.mubr.f32.vlgmr.msra.gmra.mrb[2].mxu0 %v718_v39 }
 0x3e6   : > { %v805_v42 = vpop.f32.mrb[2].mxu0 }
 0x3e7   : > { %v806_v43 = vadd.f32 %v805_v42, %v738_v41  ;;  %v1129_v44 = vpop.f32.mrb[3].mxu0 }
 0x3e9   : > { %809 = vst [vmem:[%s368_s22] sm:$0xff] %v806_v43 }
 0x3ea   : > { %1415 = shalt.err (!%p1412_p0)
}
 0x3eb   : > { %s1416_s16 = scalar_lea.hbm %s1782_s18, 128  ;;  %s1420_s21 = scalar_lea.hbm %s1832_s8, 256 }
 0x3ec   : > { %p1417_p10 = scmp.ne.s32.totalorder %s1782_s18, %s1416_s16  ;;  %p1421_p4 = scmp.lt.u32.totalorder %s1782_s18, %s1832_s8 }
 0x3ed   : > { %p1422_p12 = scmp.lt.u32.totalorder %s1420_s21, %s1416_s16  ;;  %p1424_p8 = scmp.lt.u32.totalorder %s1416_s16, %s1782_s18 }
 0x3ee   : > { %p1418_p2 = pnand %p1417_p10, %p1856_p11 }
 0x3ef   : > { %p1423_p7 = por %p1422_p12, %p1421_p4 }
 0x3f0   : > { %p1419_p3 = pneg %p1418_p2 }
 0x3f1   : > { %p1425_p13 = por %p1424_p8, %p1423_p7 }
 0x3f3   : > { %p1426_p1 = pnand %p1425_p13, %p1419_p3 }
 0x3f5   : > { %1429 = shalt.err (!%p1426_p1)
}
 0x3f6   : > { %1221 = dma.vmem_to_hbm [thread:$0]  (%p1856_p11), %s1784_s29, 128, %s1782_s18, %s811_s26  }
 0x3f7 PF: > { %s1857_s19 = sld [smem:[#allocation18_spill]]  ;;  %p1248_p6 = scmp.ge.s32.totalorder %s1476_s30, 2 }
 0x3f8   : > { %s836_s24 = sand.u32 1, %s1464_s27  }
 0x3f9   : > { %s837_s22 = scalar_lea.sflag [#allocation4], %s836_s24 }
 0x3fd   : > { %p1858_p9 = scmp.ne.s32.totalorder %s1857_s19, 0 }
 0x3ff   : > { %p1237_p5 = pnand %p1248_p6, %p1858_p9 }
 0x401   : > { %1459 = dma.done.wait (!%p1237_p5), %s837_s22, 128  }
 0x402   : > { %1461 = vsyncadd (!%p1237_p5), %s837_s22, 4294967168  ;;  %s1859_s30 = sld [smem:[#allocation16_spill]]  ;;  %s1860_s17 = sld [smem:[#allocation15_spill]] }
 0x403   : > { %s1861_s29 = sld [smem:[#allocation17_spill]]  ;;  %s1862_s27 = smov %s1468_s28 }
 0x408   : > { %p21_p0 = scmp.ge.s32.totalorder %s1859_s30, 4   ;;  %s1863_s28 = smov %s1860_s17 }
 0x40a   :  { %23 = sbr.rel (!%p21_p0) target bundleno = 6 (0x6), region = 107 }
 0x411   :  { %842 = vsyncpa [#allocation3], 1 }
 0x412   :  { %844 = vsyncpa [#allocation3 + $0x1], 1 }
 0x413   :  { %845 = vsyncpa [#allocation6], 1 }
 0x414   :  { %846 = vsyncpa [#allocation9], 1 }
 0x415   :  { %847 = vsyncpa [#allocation4], 1 }
 0x416   :  { %849 = vsyncpa [#allocation4 + $0x1], 1 }

</bundles_post_ra>
